<compile_context>
chip_gen: v7x
topology: tpu7x:2x2x1
jax: 0.10.0
libtpu: 0.0.40
codegen_flags: <defaults>
</compile_context>

<pallas_src>
import jax
import jax.numpy as jnp
from jax import lax
from jax.experimental import pallas as pl
from jax.experimental.pallas import tpu as pltpu


_NBUF = 8  # in-flight row DMAs for the HBM gather path (always <= token block)


def _round_up(x, m):
    return ((x + m - 1) // m) * m


def _vmem_capacity_bytes():
    try:
        return int(pltpu.get_tpu_info().vmem_capacity_bytes)
    except Exception:
        return 64 << 20  # conservative default: v7x-sized per-TensorCore VMEM


# ---------------------------------------------------------------------------
# Path 1: exact one-hot MXU matmul (tiny vocabularies only).
# ---------------------------------------------------------------------------
def _onehot_matmul_kernel(idx_ref, w_ref, o_ref):
    # idx_ref: (TB, 1) int32 ids block | w_ref: (E, D) resident | o_ref: (TB, D)
    tb = o_ref.shape[0]
    e = w_ref.shape[0]
    ids = idx_ref[...]                                    # (TB, 1)
    # The (TB, E) iota/compare is regenerated each step; in the small-E regime
    # this path is restricted to, it is a handful of VPU cycles hidden under
    # the MXU / HBM-store slack.
    iota = lax.broadcasted_iota(jnp.int32, (tb, e), 1)    # (TB, E)
    # Exact 0/1 one-hot in the weight dtype (never mix dtypes on the MXU).
    onehot = (iota == ids).astype(w_ref.dtype)            # (TB, E)
    o_ref[...] = jnp.dot(
        onehot, w_ref[...], preferred_element_type=jnp.float32
    ).astype(o_ref.dtype)


# ---------------------------------------------------------------------------
# Path 2: true row gather from a VMEM-resident table (ids in SMEM).
# ---------------------------------------------------------------------------
def _row_gather_vmem_kernel(ids_ref, w_ref, o_ref):
    # ids_ref: (N,) int32 in SMEM (scalar prefetch) | w_ref: (E, D) resident
    tb = o_ref.shape[0]
    base = pl.program_id(0) * tb

    def body(r, carry):
        # Dynamic first-axis indexing on VMEM refs: true gather, no (TB,E)
        # intermediates, work scales with n*D only.
        o_ref[r, :] = w_ref[ids_ref[base + r], :]
        return carry

    lax.fori_loop(0, tb, body, 0, unroll=8)


# ---------------------------------------------------------------------------
# Path 3: row gather via per-row DMA from HBM (table does not fit in VMEM).
# ---------------------------------------------------------------------------
def _row_gather_hbm_kernel(ids_ref, w_hbm, o_ref, sems):
    # ids_ref: (N,) int32 SMEM | w_hbm: (E, D) in HBM (pl.ANY) | o_ref: (TB, D)
    tb = o_ref.shape[0]
    base = pl.program_id(0) * tb

    def start(r, slot):
        pltpu.make_async_copy(
            w_hbm.at[pl.ds(ids_ref[base + r], 1), :],
            o_ref.at[pl.ds(r, 1), :],
            sems.at[slot],
        ).start()

    # Prime _NBUF copies in flight (tb is always >= _NBUF).
    for r in range(_NBUF):
        start(r, r)

    @pl.loop(0, tb)
    def _(r):
        slot = r % _NBUF
        # Shape-only descriptor reconstruction for the wait (same byte count).
        pltpu.make_async_copy(
            w_hbm.at[pl.ds(0, 1), :],
            o_ref.at[pl.ds(r, 1), :],
            sems.at[slot],
        ).wait()

        @pl.when(r + _NBUF < tb)
        def _():
            start(r + _NBUF, slot)


# ---------------------------------------------------------------------------
# Wrapper
# ---------------------------------------------------------------------------
def aug_embedding(indices, weight, *, token_block=1024, mode=None,
                  matmul_vocab_limit=256):
    """Pallas TPU equivalent of AugEmbedding.forward (max_norm=None)."""
    # TODO(synk): max_norm in-place renormalization is not implemented (module
    # default is max_norm=None, so the forward pass is a pure gather).
    orig_shape = tuple(indices.shape)
    E, D = weight.shape
    itemsize = jnp.dtype(weight.dtype).itemsize

    flat = indices.reshape(-1).astype(jnp.int32)
    n = int(flat.shape[0])
    if n == 0:
        return jnp.zeros(orig_shape + (D,), dtype=weight.dtype)

    # Defensive clamp: out-of-range ids are UB in PyTorch; avoid OOB HBM DMAs.
    flat = jnp.clip(flat, 0, E - 1)

    sublane = {4: 8, 2: 16, 1: 32}.get(itemsize, 8)
    weight_bytes = E * D * itemsize

    vmem_cap = _vmem_capacity_bytes()
    # Generation-aware resident-table budget (~half of physical VMEM, leaving
    # headroom for double-buffered output tiles + compiler scratch):
    #   v7x: 64 MiB/TC  -> ~32 MiB resident cap; v5e/v6e: 128 MiB -> ~64 MiB.
    resident_budget = min(vmem_cap // 2, 96 << 20)

    if mode is None:
        if weight_bytes > resident_budget:
            mode = "hbm_gather"
        elif (E <= matmul_vocab_limit
              and jnp.issubdtype(weight.dtype, jnp.floating)
              and itemsize > 1):
            mode = "matmul"        # tiny vocab, float table -> MXU one-hot
        else:
            mode = "vmem_gather"   # includes int8 tables (no int MXU on v7x)
    if mode not in ("matmul", "vmem_gather", "hbm_gather"):
        raise ValueError(f"unknown mode {mode!r}")

    # Token block: large (amortizes per-step overhead, lane-dense output
    # stores), clamped to the problem size and sublane multiple of the dtype.
    tb = min(_round_up(token_block, sublane), _round_up(n, sublane))
    tb = max(tb, sublane)
    # TODO(synk): on multi-TensorCore chips (v7x) additionally clamp tb so the
    # grid has >= 2 steps per core for ("parallel",) sharding.

    # VMEM footprint per path (includes the (TB,E) intermediates the matmul
    # materializes and lane-padded (TB,1) index tiles).
    if mode == "matmul":
        def est_of(t):
            return (weight_bytes                          # resident table (1x)
                    + 2 * (t * D * itemsize + t * 4 * 128)  # dbl-buf out + idx
                    + t * E * (8 + itemsize)              # iota + cmp + one-hot
                    + t * D * 4)                          # f32 MXU result
    elif mode == "vmem_gather":
        def est_of(t):
            return weight_bytes + 2 * t * D * itemsize + (1 << 20)
    else:  # hbm_gather: table stays in HBM
        def est_of(t):
            return 2 * t * D * itemsize + (1 << 20)

    while est_of(tb) > int(vmem_cap * 0.85) and tb > sublane:
        tb = max(sublane, _round_up(tb // 2, sublane))
    est = est_of(tb)
    vmem_limit = int(min(max(est + (2 << 20), 16 << 20), vmem_cap))

    # Pad only the cheap 4-byte index array; padded ids gather row 0 and are
    # sliced away afterwards.
    n_padded = _round_up(n, tb)
    if n_padded != n:
        flat = jnp.pad(flat, (0, n_padded - n))
    grid = (n_padded // tb,)

    cparams = pltpu.CompilerParams(
        dimension_semantics=("parallel",),
        vmem_limit_bytes=vmem_limit,
    )
    out_shape = jax.ShapeDtypeStruct((n_padded, D), weight.dtype)

    if mode == "matmul":
        out = pl.pallas_call(
            _onehot_matmul_kernel,
            out_shape=out_shape,
            grid_spec=pltpu.PrefetchScalarGridSpec(
                num_scalar_prefetch=0,
                grid=grid,
                in_specs=[
                    pl.BlockSpec((tb, 1), lambda i: (i, 0)),
                    # whole table resident in VMEM, copied in once
                    pl.BlockSpec(memory_space=pltpu.MemorySpace.VMEM),
                ],
                out_specs=pl.BlockSpec((tb, D), lambda i: (i, 0)),
            ),
            compiler_params=cparams,
        )(flat.reshape(n_padded, 1), weight)
    elif mode == "vmem_gather":
        # TODO(synk): very large index counts (>~1e5 tokens/call) can overflow
        # SMEM via scalar prefetch; chunk the call at the wrapper level.
        out = pl.pallas_call(
            _row_gather_vmem_kernel,
            out_shape=out_shape,
            grid_spec=pltpu.PrefetchScalarGridSpec(
                num_scalar_prefetch=1,
                grid=grid,
                in_specs=[pl.BlockSpec(memory_space=pltpu.MemorySpace.VMEM)],
                out_specs=pl.BlockSpec((tb, D), lambda i, ids: (i, 0)),
            ),
            compiler_params=cparams,
        )(flat, weight)
    else:  # hbm_gather
        out = pl.pallas_call(
            _row_gather_hbm_kernel,
            out_shape=out_shape,
            grid_spec=pltpu.PrefetchScalarGridSpec(
                num_scalar_prefetch=1,
                grid=grid,
                in_specs=[pl.BlockSpec(memory_space=pl.ANY)],
                out_specs=pl.BlockSpec((tb, D), lambda i, ids: (i, 0)),
                scratch_shapes=[pltpu.SemaphoreType.DMA((_NBUF,))],
            ),
            compiler_params=cparams,
        )(flat, weight)

    if n_padded != n:
        out = out[:n]
    return out.reshape(*orig_shape, D)


if __name__ == "__main__":
    # Module config (synthetic, deterministic init matching reset_parameters)
    num_embeddings = 16
    embedding_dim = 128
    padding_idx = 0

    key = jax.random.PRNGKey(0)
    k_w, k_idx, k_idx2, k_w2, k_idx3 = jax.random.split(key, 5)

    # weight ~ N(0, 1), padding_idx row zeroed (as in reset_parameters)
    weight = jax.random.normal(k_w, (num_embeddings, embedding_dim),
                               dtype=jnp.float32)
    weight = weight.at[padding_idx].set(0.0)

    # 1) small batch of 2 samples of 8 indices (single tile, matmul path)
    indices = jax.random.randint(k_idx, (2, 8), 0, num_embeddings,
                                 dtype=jnp.int32)
    indices = indices.at[0, 0].set(padding_idx)
    out = jax.block_until_ready(aug_embedding(indices, weight))
    ref = jnp.take(weight, indices, axis=0)
    assert out.shape == (2, 8, embedding_dim), out.shape
    assert jnp.array_equal(out, ref), "mismatch (f32, matmul path, small)"
    assert jnp.all(out[0, 0] == 0.0), "padding_idx row should be zeros"

    # 2) larger (4, 300): token_block=1024, index padding, multi-step grid
    indices2 = jax.random.randint(k_idx2, (4, 300), 0, num_embeddings,
                                  dtype=jnp.int32)
    out2 = jax.block_until_ready(aug_embedding(indices2, weight))
    ref2 = jnp.take(weight, indices2, axis=0)
    assert out2.shape == (4, 300, embedding_dim), out2.shape
    assert jnp.array_equal(out2, ref2), "mismatch (f32, matmul path, multi-tile)"

    # 3) bf16 table (matmul path, 16-row sublane tiling, exact 0/1 one-hot)
    weight_bf16 = jax.random.normal(
        k_w2, (num_embeddings, embedding_dim), dtype=jnp.float32
    ).astype(jnp.bfloat16)
    weight_bf16 = weight_bf16.at[padding_idx].set(0)
    indices3 = jax.random.randint(k_idx3, (3, 100), 0, num_embeddings,
                                  dtype=jnp.int32)
    out3 = jax.block_until_ready(aug_embedding(indices3, weight_bf16))
    ref3 = jnp.take(weight_bf16, indices3, axis=0)
    assert out3.dtype == jnp.bfloat16
    assert jnp.array_equal(out3, ref3), "mismatch (bf16, matmul path)"

    # 4) forced VMEM-resident row-gather path (used when E > matmul_vocab_limit)
    out4 = jax.block_until_ready(
        aug_embedding(indices2, weight, mode="vmem_gather", token_block=256))
    assert jnp.array_equal(out4, ref2), "mismatch (f32, vmem_gather path)"

    # 5) forced HBM DMA row-gather path (used when the table exceeds VMEM)
    out5 = jax.block_until_ready(
        aug_embedding(indices2, weight, mode="hbm_gather", token_block=128))
    assert jnp.array_equal(out5, ref2), "mismatch (f32, hbm_gather path)"

    print("KERNEL_OK")
</pallas_src>

<mosaic_0001>
module attributes {stable_mosaic.version = 11 : i64} {
  func.func @_onehot_matmul_kernel(%arg0: i32, %arg1: memref<16x1xi32, #tpu.memory_space<vmem>>, %arg2: memref<16x128xf32, #tpu.memory_space<vmem>>, %arg3: memref<16x128xf32, #tpu.memory_space<vmem>>) attributes {dimension_semantics = [#tpu.dimension_semantics<parallel>], iteration_bounds = array<i64: 1>, scalar_prefetch = 0 : i64, scratch_operands = 0 : i64, tpu.core_type = #tpu.core_type<tc>, window_params = [{transform_indices = @transform_0, window_bounds = array<i64: 16, 1>}, {pipeline_mode = #tpu.pipeline_mode<synchronous>, transform_indices = @transform_1, window_bounds = array<i64: 16, 128>}, {transform_indices = @transform_2, window_bounds = array<i64: 16, 128>}]} {
    %c0 = arith.constant 0 : index
    %c0_0 = arith.constant 0 : index
    %0 = vector.load %arg1[%c0, %c0_0] : memref<16x1xi32, #tpu.memory_space<vmem>>, vector<16x1xi32>
    %1 = tpu.iota {dimensions = array<i32: 1>} : vector<16x16xi32>
    %2 = vector.broadcast %0 : vector<16x1xi32> to vector<16x16xi32>
    %3 = arith.cmpi eq, %1, %2 : vector<16x16xi32>
    %4 = arith.extui %3 : vector<16x16xi1> to vector<16x16xi32>
    %5 = arith.sitofp %4 : vector<16x16xi32> to vector<16x16xf32>
    %c0_1 = arith.constant 0 : index
    %c0_2 = arith.constant 0 : index
    %6 = vector.load %arg2[%c0_1, %c0_2] : memref<16x128xf32, #tpu.memory_space<vmem>>, vector<16x128xf32>
    %cst = arith.constant dense<0.000000e+00> : vector<16x128xf32>
    %7 = tpu.matmul %5, %6, %cst {dimension_numbers = #tpu.dot_dimension_numbers<[1], [0], [0], [1], [0, 0, 1, 1], [], []>} : vector<16x16xf32>, vector<16x128xf32>, vector<16x128xf32> -> vector<16x128xf32>
    %c0_3 = arith.constant 0 : index
    %c0_4 = arith.constant 0 : index
    %8 = vector.load %arg3[%c0_3, %c0_4] : memref<16x128xf32, #tpu.memory_space<vmem>>, vector<16x128xf32>
    tpu.vector_store %arg3[%c0_3, %c0_4], %7 {strides = array<i32>} : memref<16x128xf32, #tpu.memory_space<vmem>>, vector<16x128xf32>,
    return
  }
  func.func @transform_0(%arg0: i32) -> (i32, i32) {
    %c0_i32 = arith.constant 0 : i32
    %c0_i32_0 = arith.constant 0 : i32
    return %arg0, %c0_i32 : i32, i32
  }
  func.func @transform_1(%arg0: i32) -> (i32, i32) {
    %c0_i32 = arith.constant 0 : i32
    %c0_i32_0 = arith.constant 0 : i32
    %c0_i32_1 = arith.constant 0 : i32
    return %c0_i32, %c0_i32_0 : i32, i32
  }
  func.func @transform_2(%arg0: i32) -> (i32, i32) {
    %c0_i32 = arith.constant 0 : i32
    %c0_i32_0 = arith.constant 0 : i32
    return %arg0, %c0_i32 : i32, i32
  }
}

</mosaic_0001>

<bundles_post_ra>
// kernel: tpu_custom_call.1
= control target key start
LH: loop header
LB: loop body
LE: loop exit
PB: predicated region body
PF: predicated region fallthrough
CT: control target
= control target key end

     0   :  { %s223_s0 = inlined_call_operand.vmem [shape: s32[16,1], index: 0, kind: input, shape index: {}]   ;;  %s224_s1 = inlined_call_operand.vmem [shape: f32[16,128], index: 1, kind: input, shape index: {}]   ;;  %s225_s2 = inlined_call_operand.hbm [shape: f32[16,128], index: 2, kind: output, shape index: {}]  }
   0x1   :  { %v12_v0 = vld [vmem:[%s223_s0] sm:$0xff] }
   0x2   :  { %7 = vsyncpa [#allocation3], 0  ;;  %v179_v1 = vmov 0   ;;  %v28_v2 = vld [vmem:[%s224_s1] sm:$0xff]  ;;  %v29_v3 = vld [vmem:[%s224_s1 + $0x8] sm:$0xff]  ;;  %v14_v6 = vlaneseq  ;;  %vm30_vm0 = vcmask 130048  }
   0x3   :  { %154 = vset.pattern.permute.xlu0 %v179_v1  ;;  %v145_v4 = vpack.c.bf16 %v29_v3, %v28_v2  ;;  %v13_v5 = vld [vmem:[%s223_s0 + $0x8] sm:$0xff]  ;;  %v180_v9 = vmov 0.0   ;;  %s181_s1 = smov [#allocation2]  }
   0x4   :  { %17 = vperm.xlu0 %154, %v12_v0   ;;  %v15_v7 = vand.u32 127, %v14_v6  ;;  %s119_s17 = sshll.u32 %s181_s1, 4  ;;  %s120_s17 = int_to_ptr.vmem [resolvable:$true] %s119_s17 }
   0x5   :  { %146 = vmatprep.subr.bf16.mxu0 %v145_v4  ;;  %s155_s0 = scalar_lea.vmem %s120_s17, 256  ;;  %p160_p1 = scmp.lt.s32.totalorder %s120_s17, %s120_s17 }
   0x6   :  { %148 = vmatpush3.bf16.msra.mxu0 %v145_v4  ;;  %p156_p0 = scmp.ne.s32.totalorder %s120_s17, %s155_s0  ;;  %p161_p2 = scmp.lt.s32.totalorder %s155_s0, %s155_s0 }
   0x8   :  { %20 = vperm.xlu0 %154, %v13_v5   ;;  %p162_p3 = por %p161_p2, %p160_p1 }
   0xa   :  { %p163_p4 = pnand %p162_p3, %p156_p0 }
  0x83   :  { %v18_v8 = vpop.permute.xlu0 %17 }
  0x84   :  { %vm22_vm1 = vcmp.eq.s32.totalorder %v15_v7, %v18_v8 }
  0x85   :  { %v130_v10 = vsel %vm22_vm1, 1.0, %v180_v9 }
  0x86   :  { %142 = vmatprep.mubr.msk.f32.mxu0 %vm30_vm0, %v130_v10 }
  0x87   :  { %v21_v11 = vpop.permute.xlu0 %20 }
  0x88   :  { %vm23_vm2 = vcmp.eq.s32.totalorder %v15_v7, %v21_v11 }
  0x89   :  { %v131_v12 = vsel %vm23_vm2, 1.0, %v180_v9 }
  0x8a   :  { %143 = vmatmul.mubr.msk.f32.vlgmr.msra.gmra.mrb[0].mxu0 %vm30_vm0, %v131_v12 }
 0x15d   :  { %v144_v13 = vpop.f32.mrb[0].mxu0 }
 0x15e   :  { %113 = vst [vmem:[#allocation2 + $0x8] sm:$0xff] %v144_v13  ;;  %v103_v14 = vpop.f32.mrb[1].mxu0 }
 0x15f   :  { %112 = vst [vmem:[#allocation2] sm:$0xff] %v103_v14 }
 0x160   :  { %166 = shalt.err (!%p163_p4)
}
 0x161   :  { %s167_s20 = scalar_lea.hbm %s225_s2, 256 }
 0x162   :  { %p168_p5 = scmp.ne.s32.totalorder %s225_s2, %s167_s20  ;;  %p171_p6 = scmp.lt.u32.totalorder %s167_s20, %s225_s2 }
 0x164   :  { %p173_p7 = pnand %p171_p6, %p168_p5 }
 0x166   :  { %176 = shalt.err (!%p173_p7)
}
 0x167   :  { %s182_s25 = smov 128   ;;  %s183_s26 = smov 8  }
 0x168   :  { %125 = dma.vmem_to_hbm [thread:$0]  %s120_s17, 256, %s225_s2, [#allocation3], %s182_s25, %s182_s25, %s183_s26  }
 0x169   :  { %177 = dma.done.wait [#allocation3], 256  }
 0x16a   :  { %178 = vsyncadd [#allocation3], 4294967040 }
 0x16b   :  { %129 = vsyncpa [#allocation3], 1 }

</bundles_post_ra>
